<compile_context>
chip_gen: v5e
topology: v5e:2x2
jax: 0.10.0
libtpu: 0.0.40
codegen_flags: <defaults>
</compile_context>

<pallas_src>
import jax
import jax.numpy as jnp
from jax.experimental import pallas as pl
from jax.experimental.pallas import tpu as pltpu

IN_FEATURES = 10
OUT_FEATURES = 1
PACK = 16            # padded feature width (10 -> 16): power-of-two lane segment
LANES = 128          # samples per packed row == output lane width
GRANULE = 8 * LANES  # 1024: minimal batch-tile granule (8 sublanes of packed rows)


def _round_up(n, m):
    return ((n + m - 1) // m) * m


def linear_kernel(x_ref, s_ref, b_ref, o_ref):
    """One batch tile of y = x @ w.T + b in packed / lane-dense layout.

    x_ref: [tb/128, 128*PACK] f32  packed activations: sample 128*p+q occupies
                                   lanes [PACK*q, PACK*(q+1)) of row p
    s_ref: [128*PACK, 128]    f32  segment-sum weight matrix (VMEM-resident,
                                   constant across grid steps)
    b_ref: [1, 1]             f32  bias scalar in SMEM
    o_ref: [tb/128, 128]           lane-dense output: o[p, q] = y[128*p + q]
    """
    # Single MXU dot = per-sample multiply + segment reduce; result lane-dense.
    acc = jnp.dot(x_ref[...], s_ref[...], preferred_element_type=jnp.float32)
    o_ref[...] = (acc + b_ref[0, 0]).astype(o_ref.dtype)


def linear_pallas(x, w, b, *, tile_b=8192, min_pallas_batch=2048):
    """torch nn.Linear(10, 1) forward: y = x @ w.T + b.

    x: [B, 10] f32, w: [1, 10] f32 (torch layout [OUT, IN]), b: [1] f32 -> y: [B, 1]
    """
    B, IN = x.shape
    OUT, IN_w = w.shape
    assert IN == IN_w == IN_FEATURES and OUT == OUT_FEATURES

    w = w.astype(jnp.float32)
    b = b.astype(jnp.float32)

    # Small-batch fast path: pallas_call launch + one grid step costs more than
    # the whole op at small B.
    if B < min_pallas_batch:
        return (x @ w.T + b).astype(x.dtype)

    # ---- tile selection -----------------------------------------------------
    # tb = samples per grid step; a multiple of GRANULE (=1024) so both the
    # packed x block [tb/128, 2048] and the out block [tb/128, 128] satisfy the
    # (8,128) block-shape constraint with zero layout padding.
    b_granule = _round_up(B, GRANULE)
    tb = min(tile_b, b_granule)
    if b_granule >= 2 * GRANULE:
        # Keep >= 2 grid steps so both TensorCores get tiles on v7x megacore.
        tb = min(tb, _round_up(b_granule // 2, GRANULE))
    bp = _round_up(B, tb)          # padded batch (zero rows, sliced off below)
    grid = (bp // tb,)

    # ---- packing ------------------------------------------------------------
    # Zero-pad features 10 -> 16 and batch B -> bp (required so padded lanes do
    # not leak into the sums), then pack 128 samples per row:
    #   x_packed[p, 16*q + k] = x[128*p + q, k]
    # TODO(synk): this pad/reshape is one extra XLA pass over x; in a real model
    # it should be fused into the producer of x (or x kept pre-packed).
    x_pad = jnp.pad(x.astype(jnp.float32), ((0, bp - B), (0, PACK - IN)))
    x_packed = x_pad.reshape(bp // LANES, LANES * PACK)

    # Segment-sum matrix: S[16*q + k, j] = w[k] if j == q else 0, so that
    # (x_packed @ S)[p, j] = sum_k x[128*p + j, k] * w[k]   (lane-dense).
    w_pad = jnp.pad(w[0], (0, PACK - IN))                                # [16]
    eye = jnp.eye(LANES, dtype=jnp.float32)                              # [128,128]
    seg = (eye[:, None, :] * w_pad[None, :, None]).reshape(LANES * PACK, LANES)

    b_smem = b.reshape(1, 1)

    out_packed = pl.pallas_call(
        linear_kernel,
        out_shape=jax.ShapeDtypeStruct((bp // LANES, LANES), x.dtype),
        grid=grid,
        in_specs=[
            # batch-tiled packed activations: fully lane-dense vregs
            pl.BlockSpec((tb // LANES, LANES * PACK), lambda i: (i, 0)),
            # segment-sum weights: constant index_map -> stays VMEM-resident
            pl.BlockSpec((LANES * PACK, LANES), lambda i: (0, 0)),
            # bias scalar in SMEM (no padded VMEM tile, no per-step vector DMA)
            pl.BlockSpec(memory_space=pltpu.MemorySpace.SMEM),
        ],
        # lane-dense output block -> unmasked full-vreg stores
        out_specs=pl.BlockSpec((tb // LANES, LANES), lambda i: (i, 0)),
        compiler_params=pltpu.CompilerParams(
            dimension_semantics=("parallel",),   # shard batch tiles across TCs
        ),
    )(x_packed, seg, b_smem)

    # [bp/128, 128] -> [bp, 1] -> drop padded rows (flatten order == sample order).
    return out_packed.reshape(bp, 1)[:B].astype(x.dtype)


if __name__ == "__main__":
    key = jax.random.PRNGKey(0)
    k_x1, k_x2, k_x3, k_w, k_b = jax.random.split(key, 5)

    # Deterministic parameter init (uniform +-1/sqrt(fan_in), like torch default).
    bound = 1.0 / jnp.sqrt(IN_FEATURES)
    W = jax.random.uniform(k_w, (OUT_FEATURES, IN_FEATURES),
                           minval=-bound, maxval=bound, dtype=jnp.float32)
    b = jax.random.uniform(k_b, (OUT_FEATURES,),
                           minval=-bound, maxval=bound, dtype=jnp.float32)

    def ref(x):
        return x @ W.T + b

    # 1) Small batch (module-sized input): exercises the XLA fast path.
    x_small = jax.random.normal(k_x1, (8, IN_FEATURES), dtype=jnp.float32)
    y_small = jax.block_until_ready(linear_pallas(x_small, W, b))
    assert y_small.shape == (8, OUT_FEATURES)
    assert jnp.allclose(y_small, ref(x_small), atol=1e-5, rtol=1e-5)

    # 2) Non-multiple-of-128 batch: Pallas path with batch padding and a 2-step grid.
    x_mid = jax.random.normal(k_x2, (3000, IN_FEATURES), dtype=jnp.float32)
    y_mid = jax.block_until_ready(linear_pallas(x_mid, W, b))
    assert y_mid.shape == (3000, OUT_FEATURES)
    assert jnp.allclose(y_mid, ref(x_mid), atol=1e-5, rtol=1e-5)

    # 3) Larger, tile-aligned batch: two 4096-sample tiles (megacore-parallel).
    x_big = jax.random.normal(k_x3, (8192, IN_FEATURES), dtype=jnp.float32)
    y_big = jax.block_until_ready(linear_pallas(x_big, W, b))
    assert y_big.shape == (8192, OUT_FEATURES)
    assert jnp.allclose(y_big, ref(x_big), atol=1e-5, rtol=1e-5)

    print("KERNEL_OK")
</pallas_src>

<mosaic_0001>
module attributes {stable_mosaic.version = 11 : i64} {
  func.func @linear_kernel(%arg0: i32, %arg1: memref<16x2048xf32, #tpu.memory_space<vmem>>, %arg2: memref<2048x128xf32, #tpu.memory_space<vmem>>, %arg3: memref<1x1xf32, #tpu.memory_space<smem>>, %arg4: memref<16x128xf32, #tpu.memory_space<vmem>>) attributes {dimension_semantics = [#tpu.dimension_semantics<parallel>], iteration_bounds = array<i64: 2>, scalar_prefetch = 0 : i64, scratch_operands = 0 : i64, tpu.core_type = #tpu.core_type<tc>, window_params = [{transform_indices = @transform_0, window_bounds = array<i64: 16, 2048>}, {pipeline_mode = #tpu.pipeline_mode<synchronous>, transform_indices = @transform_1, window_bounds = array<i64: 2048, 128>}, {transform_indices = @transform_2, window_bounds = array<i64: 1, 1>}, {transform_indices = @transform_3, window_bounds = array<i64: 16, 128>}]} {
    %c0 = arith.constant 0 : index
    %c0_0 = arith.constant 0 : index
    %0 = vector.load %arg1[%c0, %c0_0] : memref<16x2048xf32, #tpu.memory_space<vmem>>, vector<16x2048xf32>
    %c0_1 = arith.constant 0 : index
    %c0_2 = arith.constant 0 : index
    %1 = vector.load %arg2[%c0_1, %c0_2] : memref<2048x128xf32, #tpu.memory_space<vmem>>, vector<2048x128xf32>
    %cst = arith.constant dense<0.000000e+00> : vector<16x128xf32>
    %2 = tpu.matmul %0, %1, %cst {dimension_numbers = #tpu.dot_dimension_numbers<[1], [0], [0], [1], [0, 0, 1, 1], [], []>} : vector<16x2048xf32>, vector<2048x128xf32>, vector<16x128xf32> -> vector<16x128xf32>
    %c0_3 = arith.constant 0 : index
    %c0_4 = arith.constant 0 : index
    %3 = memref.load %arg3[%c0_3, %c0_4] : memref<1x1xf32, #tpu.memory_space<smem>>
    %4 = vector.broadcast %3 : f32 to vector<16x128xf32>
    %5 = arith.addf %2, %4 : vector<16x128xf32>
    %c0_5 = arith.constant 0 : index
    %c0_6 = arith.constant 0 : index
    %6 = vector.load %arg4[%c0_5, %c0_6] : memref<16x128xf32, #tpu.memory_space<vmem>>, vector<16x128xf32>
    tpu.vector_store %arg4[%c0_5, %c0_6], %5 {strides = array<i32>} : memref<16x128xf32, #tpu.memory_space<vmem>>, vector<16x128xf32>,
    return
  }
  func.func @transform_0(%arg0: i32) -> (i32, i32) {
    %c0_i32 = arith.constant 0 : i32
    %c0_i32_0 = arith.constant 0 : i32
    return %arg0, %c0_i32 : i32, i32
  }
  func.func @transform_1(%arg0: i32) -> (i32, i32) {
    %c0_i32 = arith.constant 0 : i32
    %c0_i32_0 = arith.constant 0 : i32
    %c0_i32_1 = arith.constant 0 : i32
    return %c0_i32, %c0_i32_0 : i32, i32
  }
  func.func @transform_2(%arg0: i32) -> (i32, i32) {
    %c0_i32 = arith.constant 0 : i32
    %c0_i32_0 = arith.constant 0 : i32
    %c0_i32_1 = arith.constant 0 : i32
    return %c0_i32, %c0_i32_0 : i32, i32
  }
  func.func @transform_3(%arg0: i32) -> (i32, i32) {
    %c0_i32 = arith.constant 0 : i32
    %c0_i32_0 = arith.constant 0 : i32
    return %arg0, %c0_i32 : i32, i32
  }
}

</mosaic_0001>

<bundles_post_ra>
// kernel: tpu_custom_call.1
= control target key start
LH: loop header
LB: loop body
LE: loop exit
PB: predicated region body
PF: predicated region fallthrough
CT: control target
= control target key end

     0   :  { %s1392_s0 = inlined_call_operand.hbm [shape: f32[32,2048], index: 0, kind: input, shape index: {}]   ;;  %s1393_s1 = inlined_call_operand.hbm [shape: f32[2048,128], index: 1, kind: input, shape index: {}]   ;;  %s1394_s2 = inlined_call_operand.<no memory space> [shape: f32[1,1], index: 2, kind: input, shape index: {}]   ;;  %s1395_s3 = inlined_call_operand.hbm [shape: f32[32,128], index: 3, kind: output, shape index: {}]  }
   0x1   :  { %8 = sst [smem:[#allocation2]] %s1394_s2 }
   0x2   :  { %9 = vsyncpa [#allocation4], 0 }
   0x3   :  { %11 = vsyncpa [#allocation4 + $0x1], 0 }
   0x4   :  { %12 = vsyncpa [#allocation7], 0 }
   0x5   :  { %13 = vsyncpa [#allocation5], 0 }
   0x6   :  { %15 = vsyncpa [#allocation5 + $0x1], 0  ;;  %s1214_s14 = smov 0   ;;  %s1216_s15 = smov 0  }
   0x7   :  { %s1218_s16 = smov 0   ;;  %s1220_s17 = smov 0  }
   0x8 LB: > { %s1235_s2 = sadd.s32 4294967295, %s1183_s17   ;;  %s971_s18 = sadd.s32 4294967294, %s1183_s17   ;;  %s1183_s17 = sphi %s1220_s17, %s1405_s17   ;;  %s1179_s16 = sphi %s1218_s16, %s1404_s16   ;;  %s1175_s15 = sphi %s1216_s15, %s1403_s15   ;;  %s1171_s14 = sphi %s1214_s14, %s1402_s14  }
   0x9   : > { %p41_p0 = scmp.ne.s32.totalorder %s1175_s15, %s1171_s14  ;;  %p42_p1 = scmp.eq.s32.totalorder %s1235_s2, 0 }
   0xa   : > { %p107_p2 = scmp.eq.s32.totalorder %s1235_s2, 1  ;;  %p113_p3 = scmp.eq.s32.totalorder %s971_s18, 1 }
   0xb   : > { %p1244_p4 = por %p42_p1, %p41_p0  ;;  %p972_p5 = scmp.ge.s32.totalorder %s1183_s17, 1 }
   0xc   : > { %p1249_p6 = por %p113_p3, %p41_p0  ;;  %p120_p7 = scmp.lt.s32.totalorder %s1183_s17, 3 }
   0xd   : > { %s131_s23 = sshll.u32 %s1393_s1, 4  ;;  %s1185_s25 = smov [#allocation6]   ;;  %s132_s23 = int_to_ptr.hbm [resolvable:$true] %s131_s23 }
   0xe   : > { %p1257_p8 = pnand %p972_p5, %p120_p7  ;;  %s133_s26 = sshll.u32 %s1185_s25, 4  ;;  %s134_s26 = int_to_ptr.vmem [resolvable:$true] %s133_s26 }
   0xf   : > { %s1267_s27 = sadd.s32 1, %s1183_s17   ;;  %s1186_s28 = smov 128  }
  0x10   : > { %p999_p9 = pneg %p1257_p8  ;;  %s1187_s29 = smov 8  }
  0x11   : > { %s25_s30 = ssub.s32 %s1183_s17, %s1267_s27  ;;  %s28_s4 = sadd.s32 1, %s1179_s16 }
  0x12   : > { %p1000_p10 = pnand %p999_p9, %p42_p1  ;;  %p26_p12 = scmp.eq.s32.totalorder %s25_s30, 0 }
  0x13   : > { %p35_p13 = scmp.ne.s32.totalorder %s1179_s16, %s1175_s15  ;;  %p36_p0 = scmp.eq.s32.totalorder %s1183_s17, 0 }
  0x14   : > { %1002 = dma.hbm_to_vmem [thread:$0]  (!%p1000_p10), %s132_s23, 32768, %s134_s26, [#allocation7], %s1186_s28, %s1186_s28, %s1187_s29  }
  0x15   : > { %p1012_p3 = scmp.lt.s32.totalorder %s1183_s17, 2  ;;  %p37_p5 = por %p36_p0, %p35_p13 }
  0x16   : > { %s1279_s5 = scalar_select %p26_p12, %s1179_s16, %s28_s4  }
  0x17   : > { %p1283_p7 = por %p107_p2, %p35_p13  ;;  %s150_s7 = sand.u32 1, %s1179_s16  }
  0x18   : > { %s989_s8 = sshll.u32 %s1183_s17, 8  ;;  %s975_s9 = sshll.u32 %s150_s7, 8 }
  0x19   : > { %s160_s12 = scalar_lea.hbm %s1392_s0, %s989_s8  ;;  %s154_s18 = scalar_lea.vmem [#allocation3], %s975_s9 }
  0x1a   : > { %s161_s13 = sshll.u32 %s160_s12, 4  ;;  %s163_s21 = sshll.u32 %s154_s18, 4  ;;  %s162_s13 = int_to_ptr.hbm [resolvable:$true] %s161_s13  ;;  %s164_s21 = int_to_ptr.vmem [resolvable:$true] %s163_s21 }
  0x1b   : > { %p1294_p9 = pnand %p1012_p3, %p37_p5  ;;  %s151_s23 = scalar_lea.sflag [#allocation4], %s150_s7 }
  0x1c   : > { %s1083_s25 = sshra.s32 %s162_s13, 4  ;;  %s1090_s4 = scalar_lea.hbm %s1392_s0, 512  ;;  %s1084_s25 = int_to_ptr.hbm [resolvable:$true] %s1083_s25 }
  0x1d   : > { %s1085_s26 = scalar_lea.hbm %s1084_s25, 256  ;;  %p1087_p10 = pneg %p1294_p9 }
  0x1e   : > { %p1086_p2 = scmp.ne.s32.totalorder %s1084_s25, %s1085_s26  ;;  %p1091_p0 = scmp.lt.s32.totalorder %s1084_s25, %s1392_s0 }
  0x1f   : > { %p1092_p3 = scmp.lt.s32.totalorder %s1090_s4, %s1085_s26 }
  0x20   : > { %p1088_p12 = pnand %p1087_p10, %p1086_p2 }
  0x21   : > { %p1093_p5 = por %p1092_p3, %p1091_p0 }
  0x22   : > { %p1089_p13 = pneg %p1088_p12 }
  0x24   : > { %p1094_p11 = pnand %p1093_p5, %p1089_p13 }
  0x26   : > { %1097 = shalt.err (!%p1094_p11)
}
  0x27   : > { %s1188_s7 = smov 2048   ;;  %175 = sbr.rel (%p1257_p8) target bundleno = 336 (0x150), region = 32 }
  0x28   : > { %1006 = dma.hbm_to_vmem [thread:$0]  (!%p1294_p9), %s162_s13, 4096, %s164_s21, %s151_s23, %s1188_s7, %s1188_s7, %s1186_s28  }
  0x29   : > { %s1312_s10 = sand.u32 (!%p1257_p8), 1, %s1175_s15  }
  0x2a   : > { %s980_s11 = sshll.u32 (!%p1257_p8), %s1312_s10, 8  ;;  %s178_s12 = scalar_lea.sflag (!%p1257_p8), [#allocation4], %s1312_s10 }
  0x2b   : > { %s1316_s18 = scalar_lea.vmem (!%p1257_p8), [#allocation3], %s980_s11 }
  0x2c   : > { %1158 = dma.done.wait (%p1244_p4), %s178_s12, 4096  }
  0x2d   : > { %1160 = vsyncadd (%p1244_p4), %s178_s12, 4294963200 }
  0x2e   : > { %1162 = dma.done.wait (%p42_p1), [#allocation7], 32768  }
  0x2f   : > { %1164 = vsyncadd (%p42_p1), [#allocation7], 4294934528  ;;  %v259_v0 = vld [vmem:[#allocation6 + $0x78] sm:$0xff]  ;;  %v258_v2 = vld [vmem:[#allocation6 + $0x70] sm:$0xff]  ;;  %s500_s19 = sld [smem:[#allocation2]]  ;;  %s982_s24 = sshll.u32 %s1312_s10, 4 }
  0x30   : > { %v291_v1 = vld [vmem:[#allocation6 + $0x178] sm:$0xff]  ;;  %502 = vmatpush.msra.mxu0 %v259_v0  ;;  %v290_v4 = vld [vmem:[#allocation6 + $0x170] sm:$0xff]  ;;  %v257_v6 = vld [vmem:[#allocation6 + $0x68] sm:$0xff]  ;;  %s990_s28 = sshll.u32 %s1235_s2, 4  ;;  %s209_s23 = scalar_lea.vmem [#allocation8], %s982_s24 }
  0x31   : > { %548 = vmatpush.msra.mxu2 %v291_v1  ;;  %v275_v3 = vld [vmem:[#allocation6 + $0xf8] sm:$0xff]  ;;  %v274_v7 = vld [vmem:[#allocation6 + $0xf0] sm:$0xff]  ;;  %v289_v8 = vld [vmem:[#allocation6 + $0x168] sm:$0xff]  ;;  %s884_s22 = scalar_lea.hbm %s1395_s3, %s990_s28  ;;  %s885_s25 = sshll.u32 %s209_s23, 4  ;;  %s886_s25 = int_to_ptr.vmem [resolvable:$true] %s885_s25 }
  0x32   : > { %v307_v5 = vld [vmem:[#allocation6 + $0x1f8] sm:$0xff]  ;;  %525 = vmatpush.msra.mxu1 %v275_v3  ;;  %503 = vmatpush.msra.mxu0 %v258_v2  ;;  %v306_v9 = vld [vmem:[#allocation6 + $0x1f0] sm:$0xff]  ;;  %v273_v10 = vld [vmem:[#allocation6 + $0xe8] sm:$0xff]  ;;  %s887_s26 = sshll.u32 %s884_s22, 4  ;;  %s873_s2 = scalar_lea.sflag [#allocation5], %s1312_s10  ;;  %s888_s26 = int_to_ptr.hbm [resolvable:$true] %s887_s26 }
  0x33   : > { %571 = vmatpush.msra.mxu3 %v307_v5  ;;  %549 = vmatpush.msra.mxu2 %v290_v4  ;;  %v256_v11 = vld [vmem:[#allocation6 + $0x60] sm:$0xff]  ;;  %v305_v13 = vld [vmem:[#allocation6 + $0x1e8] sm:$0xff]  ;;  %v255_v16 = vld [vmem:[#allocation6 + $0x58] sm:$0xff]  ;;  %s1127_s29 = sshra.s32 %s888_s26, 4  ;;  %s1133_s9 = scalar_lea.hbm %s1395_s3, 32  ;;  %s1128_s29 = int_to_ptr.hbm [resolvable:$true] %s1127_s29 }
  0x34   : > { %526 = vmatpush.msra.mxu1 %v274_v7  ;;  %v288_v12 = vld [vmem:[#allocation6 + $0x160] sm:$0xff]  ;;  %504 = vmatpush.msra.mxu0 %v257_v6  ;;  %v287_v17 = vld [vmem:[#allocation6 + $0x158] sm:$0xff]  ;;  %v254_v20 = vld [vmem:[#allocation6 + $0x50] sm:$0xff]  ;;  %s1129_s30 = scalar_lea.hbm %s1128_s29, 16  ;;  %p1134_p11 = scmp.lt.s32.totalorder %s1128_s29, %s1395_s3 }
  0x35   : > { %572 = vmatpush.msra.mxu3 %v306_v9  ;;  %550 = vmatpush.msra.mxu2 %v289_v8  ;;  %v272_v14 = vld [vmem:[#allocation6 + $0xe0] sm:$0xff]  ;;  %v271_v18 = vld [vmem:[#allocation6 + $0xd8] sm:$0xff]  ;;  %v286_v21 = vld [vmem:[#allocation6 + $0x150] sm:$0xff]  ;;  %p1130_p1 = scmp.ne.s32.totalorder %s1128_s29, %s1129_s30  ;;  %p1135_p9 = scmp.lt.s32.totalorder %s1133_s9, %s1129_s30 }
  0x36   : > { %v304_v15 = vld [vmem:[#allocation6 + $0x1e0] sm:$0xff]  ;;  %527 = vmatpush.msra.mxu1 %v273_v10  ;;  %505 = vmatpush.msra.mxu0 %v256_v11  ;;  %v303_v19 = vld [vmem:[#allocation6 + $0x1d8] sm:$0xff]  ;;  %v270_v22 = vld [vmem:[#allocation6 + $0xd0] sm:$0xff] }
  0x37   : > { %573 = vmatpush.msra.mxu3 %v305_v13  ;;  %551 = vmatpush.msra.mxu2 %v288_v12  ;;  %v302_v23 = vld [vmem:[#allocation6 + $0x1d0] sm:$0xff]  ;;  %v253_v24 = vld [vmem:[#allocation6 + $0x48] sm:$0xff]  ;;  %v252_v28 = vld [vmem:[#allocation6 + $0x40] sm:$0xff]  ;;  %p1131_p4 = pnand %p1130_p1, %p1283_p7  ;;  %p1136_p2 = por %p1135_p9, %p1134_p11 }
  0x38   : > { %528 = vmatpush.msra.mxu1 %v272_v14  ;;  %506 = vmatpush.msra.mxu0 %v255_v16  ;;  %v285_v25 = vld [vmem:[#allocation6 + $0x148] sm:$0xff]  ;;  %v284_v29 = vld [vmem:[#allocation6 + $0x140] sm:$0xff]  ;;  %v251_v32 = vld [vmem:[#allocation6 + $0x38] sm:$0xff] }
  0x39   : > { %574 = vmatpush.msra.mxu3 %v304_v15  ;;  %552 = vmatpush.msra.mxu2 %v287_v17  ;;  %v269_v26 = vld [vmem:[#allocation6 + $0xc8] sm:$0xff]  ;;  %v268_v30 = vld [vmem:[#allocation6 + $0xc0] sm:$0xff]  ;;  %v283_v33 = vld [vmem:[#allocation6 + $0x138] sm:$0xff]  ;;  %p1132_p8 = pneg %p1131_p4 }
  0x3a   : > { %529 = vmatpush.msra.mxu1 %v271_v18  ;;  %507 = vmatpush.msra.mxu0 %v254_v20  ;;  %v301_v27 = vld [vmem:[#allocation6 + $0x1c8] sm:$0xff]  ;;  %v300_v31 = vld [vmem:[#allocation6 + $0x1c0] sm:$0xff]  ;;  %v267_v34 = vld [vmem:[#allocation6 + $0xb8] sm:$0xff] }
  0x3b   : > { %575 = vmatpush.msra.mxu3 %v303_v19  ;;  %553 = vmatpush.msra.mxu2 %v286_v21  ;;  %v299_v35 = vld [vmem:[#allocation6 + $0x1b8] sm:$0xff]  ;;  %v250_v36 = vld [vmem:[#allocation6 + $0x30] sm:$0xff]  ;;  %v249_v40 = vld [vmem:[#allocation6 + $0x28] sm:$0xff]  ;;  %p1137_p10 = pnand %p1136_p2, %p1132_p8 }
  0x3c   : > { %530 = vmatpush.msra.mxu1 %v270_v22  ;;  %508 = vmatpush.msra.mxu0 %v253_v24  ;;  %v282_v37 = vld [vmem:[#allocation6 + $0x130] sm:$0xff]  ;;  %v281_v41 = vld [vmem:[#allocation6 + $0x128] sm:$0xff]  ;;  %v248_v44 = vld [vmem:[#allocation6 + $0x20] sm:$0xff] }
  0x3d   : > { %576 = vmatpush.msra.mxu3 %v302_v23  ;;  %554 = vmatpush.msra.mxu2 %v285_v25  ;;  %v266_v38 = vld [vmem:[#allocation6 + $0xb0] sm:$0xff]  ;;  %v265_v42 = vld [vmem:[#allocation6 + $0xa8] sm:$0xff]  ;;  %v280_v45 = vld [vmem:[#allocation6 + $0x120] sm:$0xff] }
  0x3e   : > { %531 = vmatpush.msra.mxu1 %v269_v26  ;;  %509 = vmatpush.msra.mxu0 %v252_v28  ;;  %v298_v39 = vld [vmem:[#allocation6 + $0x1b0] sm:$0xff]  ;;  %v297_v43 = vld [vmem:[#allocation6 + $0x1a8] sm:$0xff]  ;;  %v264_v46 = vld [vmem:[#allocation6 + $0xa0] sm:$0xff] }
  0x3f   : > { %577 = vmatpush.msra.mxu3 %v301_v27  ;;  %555 = vmatpush.msra.mxu2 %v284_v29  ;;  %v296_v47 = vld [vmem:[#allocation6 + $0x1a0] sm:$0xff]  ;;  %v247_v48 = vld [vmem:[#allocation6 + $0x18] sm:$0xff]  ;;  %v246_v52 = vld [vmem:[#allocation6 + $0x10] sm:$0xff] }
  0x40   : > { %532 = vmatpush.msra.mxu1 %v268_v30  ;;  %510 = vmatpush.msra.mxu0 %v251_v32  ;;  %v279_v49 = vld [vmem:[#allocation6 + $0x118] sm:$0xff]  ;;  %v278_v53 = vld [vmem:[#allocation6 + $0x110] sm:$0xff]  ;;  %v245_v56 = vld [vmem:[#allocation6 + $0x8] sm:$0xff] }
  0x41   : > { %578 = vmatpush.msra.mxu3 %v300_v31  ;;  %556 = vmatpush.msra.mxu2 %v283_v33  ;;  %v263_v50 = vld [vmem:[#allocation6 + $0x98] sm:$0xff]  ;;  %v262_v54 = vld [vmem:[#allocation6 + $0x90] sm:$0xff]  ;;  %v277_v57 = vld [vmem:[#allocation6 + $0x108] sm:$0xff] }
  0x42   : > { %533 = vmatpush.msra.mxu1 %v267_v34  ;;  %511 = vmatpush.msra.mxu0 %v250_v36  ;;  %v295_v51 = vld [vmem:[#allocation6 + $0x198] sm:$0xff]  ;;  %v294_v55 = vld [vmem:[#allocation6 + $0x190] sm:$0xff]  ;;  %v261_v58 = vld [vmem:[#allocation6 + $0x88] sm:$0xff] }
  0x43   : > { %579 = vmatpush.msra.mxu3 %v299_v35  ;;  %557 = vmatpush.msra.mxu2 %v282_v37  ;;  %v293_v59 = vld [vmem:[#allocation6 + $0x188] sm:$0xff]  ;;  %v244_v60 = vld [vmem:[#allocation6] sm:$0xff]  ;;  %v323_v62 = vld [vmem:[#allocation6 + $0x278] sm:$0xff] }
  0x44   : > { %534 = vmatpush.msra.mxu1 %v266_v38  ;;  %512 = vmatpush.msra.mxu0 %v249_v40  ;;  %v276_v61 = vld [vmem:[#allocation6 + $0x100] sm:$0xff]  ;;  %v355_v63 = vld [vmem:[#allocation6 + $0x378] sm:$0xff]  ;;  %v322_v2 = vld [vmem:[#allocation6 + $0x270] sm:$0xff] }
  0x45   : > { %580 = vmatpush.msra.mxu3 %v298_v39  ;;  %558 = vmatpush.msra.mxu2 %v281_v41  ;;  %v260_v0 = vld [vmem:[#allocation6 + $0x80] sm:$0xff]  ;;  %v339_v3 = vld [vmem:[#allocation6 + $0x2f8] sm:$0xff]  ;;  %v354_v4 = vld [vmem:[#allocation6 + $0x370] sm:$0xff] }
  0x46   : > { %535 = vmatpush.msra.mxu1 %v265_v42  ;;  %513 = vmatpush.msra.mxu0 %v248_v44  ;;  %v292_v1 = vld [vmem:[#allocation6 + $0x180] sm:$0xff]  ;;  %v371_v5 = vld [vmem:[#allocation6 + $0x3f8] sm:$0xff]  ;;  %v321_v6 = vld [vmem:[#allocation6 + $0x268] sm:$0xff] }
  0x47   : > { %581 = vmatpush.msra.mxu3 %v297_v43  ;;  %559 = vmatpush.msra.mxu2 %v280_v45  ;;  %v338_v7 = vld [vmem:[#allocation6 + $0x2f0] sm:$0xff]  ;;  %v353_v8 = vld [vmem:[#allocation6 + $0x368] sm:$0xff]  ;;  %v320_v10 = vld [vmem:[#allocation6 + $0x260] sm:$0xff] }
  0x48   : > { %536 = vmatpush.msra.mxu1 %v264_v46  ;;  %514 = vmatpush.msra.mxu0 %v247_v48  ;;  %v370_v9 = vld [vmem:[#allocation6 + $0x3f0] sm:$0xff]  ;;  %v337_v11 = vld [vmem:[#allocation6 + $0x2e8] sm:$0xff]  ;;  %v352_v12 = vld [vmem:[#allocation6 + $0x360] sm:$0xff] }
  0x49   : > { %582 = vmatpush.msra.mxu3 %v296_v47  ;;  %560 = vmatpush.msra.mxu2 %v279_v49  ;;  %v369_v13 = vld [vmem:[#allocation6 + $0x3e8] sm:$0xff]  ;;  %v319_v14 = vld [vmem:[#allocation6 + $0x258] sm:$0xff]  ;;  %v336_v15 = vld [vmem:[#allocation6 + $0x2e0] sm:$0xff] }
  0x4a   : > { %537 = vmatpush.msra.mxu1 %v263_v50  ;;  %515 = vmatpush.msra.mxu0 %v246_v52  ;;  %v351_v16 = vld [vmem:[#allocation6 + $0x358] sm:$0xff]  ;;  %v368_v17 = vld [vmem:[#allocation6 + $0x3e0] sm:$0xff]  ;;  %v318_v18 = vld [vmem:[#allocation6 + $0x250] sm:$0xff] }
  0x4b   : > { %583 = vmatpush.msra.mxu3 %v295_v51  ;;  %561 = vmatpush.msra.mxu2 %v278_v53  ;;  %v335_v19 = vld [vmem:[#allocation6 + $0x2d8] sm:$0xff]  ;;  %v350_v20 = vld [vmem:[#allocation6 + $0x350] sm:$0xff]  ;;  %v317_v22 = vld [vmem:[#allocation6 + $0x248] sm:$0xff] }
  0x4c   : > { %538 = vmatpush.msra.mxu1 %v262_v54  ;;  %516 = vmatpush.msra.mxu0 %v245_v56  ;;  %v367_v21 = vld [vmem:[#allocation6 + $0x3d8] sm:$0xff]  ;;  %v334_v23 = vld [vmem:[#allocation6 + $0x2d0] sm:$0xff]  ;;  %v349_v24 = vld [vmem:[#allocation6 + $0x348] sm:$0xff] }
  0x4d   : > { %584 = vmatpush.msra.mxu3 %v294_v55  ;;  %562 = vmatpush.msra.mxu2 %v277_v57  ;;  %v366_v25 = vld [vmem:[#allocation6 + $0x3d0] sm:$0xff]  ;;  %v316_v26 = vld [vmem:[#allocation6 + $0x240] sm:$0xff]  ;;  %v333_v27 = vld [vmem:[#allocation6 + $0x2c8] sm:$0xff] }
  0x4e   : > { %539 = vmatpush.msra.mxu1 %v261_v58  ;;  %517 = vmatpush.msra.mxu0 %v244_v60  ;;  %v348_v28 = vld [vmem:[#allocation6 + $0x340] sm:$0xff]  ;;  %v365_v29 = vld [vmem:[#allocation6 + $0x3c8] sm:$0xff]  ;;  %v315_v30 = vld [vmem:[#allocation6 + $0x238] sm:$0xff] }
  0x4f   : > { %585 = vmatpush.msra.mxu3 %v293_v59  ;;  %563 = vmatpush.msra.mxu2 %v276_v61  ;;  %v332_v31 = vld [vmem:[#allocation6 + $0x2c0] sm:$0xff]  ;;  %v347_v32 = vld [vmem:[#allocation6 + $0x338] sm:$0xff]  ;;  %v314_v34 = vld [vmem:[#allocation6 + $0x230] sm:$0xff] }
  0x50   : > { %594 = vmatpush.msrb.mxu0 %v323_v62  ;;  %540 = vmatpush.msra.mxu1 %v260_v0  ;;  %v364_v33 = vld [vmem:[#allocation6 + $0x3c0] sm:$0xff]  ;;  %v331_v35 = vld [vmem:[#allocation6 + $0x2b8] sm:$0xff]  ;;  %v346_v36 = vld [vmem:[#allocation6 + $0x330] sm:$0xff] }
  0x51   : > { %640 = vmatpush.msrb.mxu2 %v355_v63  ;;  %586 = vmatpush.msra.mxu3 %v292_v1  ;;  %v363_v37 = vld [vmem:[#allocation6 + $0x3b8] sm:$0xff]  ;;  %v313_v38 = vld [vmem:[#allocation6 + $0x228] sm:$0xff]  ;;  %v330_v39 = vld [vmem:[#allocation6 + $0x2b0] sm:$0xff] }
  0x52   : > { %595 = vmatpush.msrb.mxu0 %v322_v2  ;;  %617 = vmatpush.msrb.mxu1 %v339_v3  ;;  %v345_v40 = vld [vmem:[#allocation6 + $0x328] sm:$0xff]  ;;  %v362_v41 = vld [vmem:[#allocation6 + $0x3b0] sm:$0xff]  ;;  %v312_v42 = vld [vmem:[#allocation6 + $0x220] sm:$0xff] }
  0x53   : > { %641 = vmatpush.msrb.mxu2 %v354_v4  ;;  %663 = vmatpush.msrb.mxu3 %v371_v5  ;;  %v329_v43 = vld [vmem:[#allocation6 + $0x2a8] sm:$0xff]  ;;  %v344_v44 = vld [vmem:[#allocation6 + $0x320] sm:$0xff]  ;;  %v214_v46 = vld [vmem:[%s1316_s18 + $0x10] sm:$0xff] }
  0x54   : > { %596 = vmatpush.msrb.mxu0 %v321_v6  ;;  %618 = vmatpush.msrb.mxu1 %v338_v7  ;;  %v361_v45 = vld [vmem:[#allocation6 + $0x3a8] sm:$0xff]  ;;  %v311_v47 = vld [vmem:[#allocation6 + $0x218] sm:$0xff]  ;;  %v328_v48 = vld [vmem:[#allocation6 + $0x2a0] sm:$0xff] }
  0x55   : > { %642 = vmatpush.msrb.mxu2 %v353_v8  ;;  %664 = vmatpush.msrb.mxu3 %v370_v9  ;;  %v343_v49 = vld [vmem:[#allocation6 + $0x318] sm:$0xff]  ;;  %v360_v50 = vld [vmem:[#allocation6 + $0x3a0] sm:$0xff]  ;;  %v310_v53 = vld [vmem:[#allocation6 + $0x210] sm:$0xff] }
  0x56   : > { %597 = vmatpush.msrb.mxu0 %v320_v10  ;;  %619 = vmatpush.msrb.mxu1 %v337_v11  ;;  %v212_v51 = vld [vmem:[%s1316_s18] sm:$0xff]  ;;  %v215_v52 = vld [vmem:[%s1316_s18 + $0x18] sm:$0xff]  ;;  %v342_v55 = vld [vmem:[#allocation6 + $0x310] sm:$0xff] }
  0x57   : > { %643 = vmatpush.msrb.mxu2 %v352_v12  ;;  %665 = vmatpush.msrb.mxu3 %v369_v13  ;;  %v327_v54 = vld [vmem:[#allocation6 + $0x298] sm:$0xff]  ;;  %v213_v57 = vld [vmem:[%s1316_s18 + $0x8] sm:$0xff]  ;;  %v326_v59 = vld [vmem:[#allocation6 + $0x290] sm:$0xff] }
  0x58   : > { %598 = vmatpush.msrb.mxu0 %v319_v14  ;;  %620 = vmatpush.msrb.mxu1 %v336_v15  ;;  %v359_v56 = vld [vmem:[#allocation6 + $0x398] sm:$0xff]  ;;  %v309_v58 = vld [vmem:[#allocation6 + $0x208] sm:$0xff]  ;;  %v358_v61 = vld [vmem:[#allocation6 + $0x390] sm:$0xff] }
  0x59   : > { %644 = vmatpush.msrb.mxu2 %v351_v16  ;;  %666 = vmatpush.msrb.mxu3 %v368_v17  ;;  %v341_v60 = vld [vmem:[#allocation6 + $0x308] sm:$0xff]  ;;  %v308_v62 = vld [vmem:[#allocation6 + $0x200] sm:$0xff]  ;;  %v230_v2 = vld [vmem:[%s1316_s18 + $0x90] sm:$0xff] }
  0x5a   : > { %599 = vmatpush.msrb.mxu0 %v318_v18  ;;  %621 = vmatpush.msrb.mxu1 %v335_v19  ;;  %v325_v63 = vld [vmem:[#allocation6 + $0x288] sm:$0xff]  ;;  %v340_v0 = vld [vmem:[#allocation6 + $0x300] sm:$0xff]  ;;  %v387_v3 = vld [vmem:[#allocation6 + $0x478] sm:$0xff] }
  0x5b   : > { %645 = vmatpush.msrb.mxu2 %v350_v20  ;;  %667 = vmatpush.msrb.mxu3 %v367_v21  ;;  %v357_v1 = vld [vmem:[#allocation6 + $0x388] sm:$0xff]  ;;  %v419_v4 = vld [vmem:[#allocation6 + $0x578] sm:$0xff]  ;;  %v324_v5 = vld [vmem:[#allocation6 + $0x280] sm:$0xff] }
  0x5c   : > { %600 = vmatpush.msrb.mxu0 %v317_v22  ;;  %622 = vmatpush.msrb.mxu1 %v334_v23  ;;  %v356_v6 = vld [vmem:[#allocation6 + $0x380] sm:$0xff]  ;;  %v231_v8 = vld [vmem:[%s1316_s18 + $0x98] sm:$0xff]  ;;  %v386_v9 = vld [vmem:[#allocation6 + $0x470] sm:$0xff] }
  0x5d   : > { %646 = vmatpush.msrb.mxu2 %v349_v24  ;;  %668 = vmatpush.msrb.mxu3 %v366_v25  ;;  %v228_v7 = vld [vmem:[%s1316_s18 + $0x80] sm:$0xff]  ;;  %v403_v10 = vld [vmem:[#allocation6 + $0x4f8] sm:$0xff]  ;;  %v418_v11 = vld [vmem:[#allocation6 + $0x570] sm:$0xff] }
  0x5e   : > { %601 = vmatpush.msrb.mxu0 %v316_v26  ;;  %623 = vmatpush.msrb.mxu1 %v333_v27  ;;  %v435_v12 = vld [vmem:[#allocation6 + $0x5f8] sm:$0xff]  ;;  %v229_v13 = vld [vmem:[%s1316_s18 + $0x88] sm:$0xff]  ;;  %v402_v15 = vld [vmem:[#allocation6 + $0x4f0] sm:$0xff] }
  0x5f   : > { %647 = vmatpush.msrb.mxu2 %v348_v28  ;;  %669 = vmatpush.msrb.mxu3 %v365_v29  ;;  %v385_v14 = vld [vmem:[#allocation6 + $0x468] sm:$0xff]  ;;  %v434_v17 = vld [vmem:[#allocation6 + $0x5f0] sm:$0xff]  ;;  %v384_v18 = vld [vmem:[#allocation6 + $0x460] sm:$0xff] }
  0x60   : > { %602 = vmatpush.msrb.mxu0 %v315_v30  ;;  %624 = vmatpush.msrb.mxu1 %v332_v31  ;;  %v417_v16 = vld [vmem:[#allocation6 + $0x568] sm:$0xff]  ;;  %v416_v20 = vld [vmem:[#allocation6 + $0x560] sm:$0xff]  ;;  %v218_v22 = vld [vmem:[%s1316_s18 + $0x30] sm:$0xff] }
  0x61   : > { %648 = vmatpush.msrb.mxu2 %v347_v32  ;;  %670 = vmatpush.msrb.mxu3 %v364_v33  ;;  %v401_v19 = vld [vmem:[#allocation6 + $0x4e8] sm:$0xff]  ;;  %v383_v23 = vld [vmem:[#allocation6 + $0x458] sm:$0xff]  ;;  %v400_v24 = vld [vmem:[#allocation6 + $0x4e0] sm:$0xff] }
  0x62   : > { %603 = vmatpush.msrb.mxu0 %v314_v34  ;;  %625 = vmatpush.msrb.mxu1 %v331_v35  ;;  %v433_v21 = vld [vmem:[#allocation6 + $0x5e8] sm:$0xff]  ;;  %v415_v25 = vld [vmem:[#allocation6 + $0x558] sm:$0xff]  ;;  %v432_v26 = vld [vmem:[#allocation6 + $0x5e0] sm:$0xff] }
  0x63   : > { %649 = vmatpush.msrb.mxu2 %v346_v36  ;;  %671 = vmatpush.msrb.mxu3 %v363_v37  ;;  %v216_v27 = vld [vmem:[%s1316_s18 + $0x20] sm:$0xff]  ;;  %v219_v28 = vld [vmem:[%s1316_s18 + $0x38] sm:$0xff]  ;;  %v382_v29 = vld [vmem:[#allocation6 + $0x450] sm:$0xff] }
  0x64   : > { %604 = vmatpush.msrb.mxu0 %v313_v38  ;;  %626 = vmatpush.msrb.mxu1 %v330_v39  ;;  %v399_v30 = vld [vmem:[#allocation6 + $0x4d8] sm:$0xff]  ;;  %v414_v31 = vld [vmem:[#allocation6 + $0x550] sm:$0xff]  ;;  %v217_v33 = vld [vmem:[%s1316_s18 + $0x28] sm:$0xff] }
  0x65   : > { %650 = vmatpush.msrb.mxu2 %v345_v40  ;;  %672 = vmatpush.msrb.mxu3 %v362_v41  ;;  %v431_v32 = vld [vmem:[#allocation6 + $0x5d8] sm:$0xff]  ;;  %v381_v34 = vld [vmem:[#allocation6 + $0x448] sm:$0xff]  ;;  %v398_v35 = vld [vmem:[#allocation6 + $0x4d0] sm:$0xff] }
  0x66   : > { %605 = vmatpush.msrb.mxu0 %v312_v42  ;;  %627 = vmatpush.msrb.mxu1 %v329_v43  ;;  %v413_v36 = vld [vmem:[#allocation6 + $0x548] sm:$0xff]  ;;  %v430_v37 = vld [vmem:[#allocation6 + $0x5d0] sm:$0xff]  ;;  %v380_v38 = vld [vmem:[#allocation6 + $0x440] sm:$0xff] }
  0x67   : > { %651 = vmatpush.msrb.mxu2 %v344_v44  ;;  %673 = vmatpush.msrb.mxu3 %v361_v45  ;;  %v397_v39 = vld [vmem:[#allocation6 + $0x4c8] sm:$0xff]  ;;  %v412_v40 = vld [vmem:[#allocation6 + $0x540] sm:$0xff]  ;;  %v379_v42 = vld [vmem:[#allocation6 + $0x438] sm:$0xff] }
  0x68   : > { %564 = vmatmul.f32.vlgmr.msra.gmra.mxu2 %v214_v46  ;;  %606 = vmatpush.msrb.mxu0 %v311_v47  ;;  %v429_v41 = vld [vmem:[#allocation6 + $0x5c8] sm:$0xff]  ;;  %v396_v43 = vld [vmem:[#allocation6 + $0x4c0] sm:$0xff]  ;;  %v411_v44 = vld [vmem:[#allocation6 + $0x538] sm:$0xff] }
  0x69   : > { %628 = vmatpush.msrb.mxu1 %v328_v48  ;;  %652 = vmatpush.msrb.mxu2 %v343_v49  ;;  %v428_v45 = vld [vmem:[#allocation6 + $0x5c0] sm:$0xff]  ;;  %v378_v46 = vld [vmem:[#allocation6 + $0x430] sm:$0xff]  ;;  %v395_v47 = vld [vmem:[#allocation6 + $0x4b8] sm:$0xff] }
  0x6a   : > { %674 = vmatpush.msrb.mxu3 %v360_v50  ;;  %518 = vmatmul.f32.vlgmr.msra.gmra.mxu0 %v212_v51  ;;  %v410_v48 = vld [vmem:[#allocation6 + $0x530] sm:$0xff]  ;;  %v427_v49 = vld [vmem:[#allocation6 + $0x5b8] sm:$0xff]  ;;  %v377_v50 = vld [vmem:[#allocation6 + $0x428] sm:$0xff] }
  0x6b   : > { %587 = vmatmul.f32.vlgmr.msra.gmra.mxu3 %v215_v52  ;;  %607 = vmatpush.msrb.mxu0 %v310_v53  ;;  %v394_v51 = vld [vmem:[#allocation6 + $0x4b0] sm:$0xff]  ;;  %v409_v52 = vld [vmem:[#allocation6 + $0x528] sm:$0xff] }
  0x6c   : > { %629 = vmatpush.msrb.mxu1 %v327_v54  ;;  %653 = vmatpush.msrb.mxu2 %v342_v55  ;;  %v426_v53 = vld [vmem:[#allocation6 + $0x5b0] sm:$0xff]  ;;  %v376_v54 = vld [vmem:[#allocation6 + $0x420] sm:$0xff]  ;;  %v393_v55 = vld [vmem:[#allocation6 + $0x4a8] sm:$0xff] }
  0x6d   : > { %675 = vmatpush.msrb.mxu3 %v359_v56  ;;  %541 = vmatmul.f32.vlgmr.msra.gmra.mxu1 %v213_v57  ;;  %v408_v56 = vld [vmem:[#allocation6 + $0x520] sm:$0xff]  ;;  %v425_v57 = vld [vmem:[#allocation6 + $0x5a8] sm:$0xff] }
  0x6e   : > { %608 = vmatpush.msrb.mxu0 %v309_v58  ;;  %630 = vmatpush.msrb.mxu1 %v326_v59  ;;  %v232_v58 = vld [vmem:[%s1316_s18 + $0xa0] sm:$0xff]  ;;  %v234_v59 = vld [vmem:[%s1316_s18 + $0xb0] sm:$0xff] }
  0x6f   : > { %654 = vmatpush.msrb.mxu2 %v341_v60  ;;  %676 = vmatpush.msrb.mxu3 %v358_v61  ;;  %v375_v60 = vld [vmem:[#allocation6 + $0x418] sm:$0xff]  ;;  %v392_v61 = vld [vmem:[#allocation6 + $0x4a0] sm:$0xff] }
  0x70   : > { %609 = vmatpush.msrb.mxu0 %v308_v62  ;;  %631 = vmatpush.msrb.mxu1 %v325_v63  ;;  %v407_v62 = vld [vmem:[#allocation6 + $0x518] sm:$0xff]  ;;  %v424_v63 = vld [vmem:[#allocation6 + $0x5a0] sm:$0xff] }
  0x71   : > { %655 = vmatpush.msrb.mxu2 %v340_v0  ;;  %677 = vmatpush.msrb.mxu3 %v357_v1  ;;  %v233_v0 = vld [vmem:[%s1316_s18 + $0xa8] sm:$0xff]  ;;  %v235_v1 = vld [vmem:[%s1316_s18 + $0xb8] sm:$0xff] }
  0x72   : > { %567 = vmatmul.f32.gmra.mxu2 %v230_v2  ;;  %686 = vmatpush.msra.mxu0 %v387_v3  ;;  %v374_v2 = vld [vmem:[#allocation6 + $0x410] sm:$0xff]  ;;  %v391_v3 = vld [vmem:[#allocation6 + $0x498] sm:$0xff] }
  0x73   : > { %732 = vmatpush.msra.mxu2 %v419_v4  ;;  %632 = vmatpush.msrb.mxu1 %v324_v5  ;;  %v406_v4 = vld [vmem:[#allocation6 + $0x510] sm:$0xff]  ;;  %v423_v5 = vld [vmem:[#allocation6 + $0x598] sm:$0xff] }
  0x74   : > { %678 = vmatpush.msrb.mxu3 %v356_v6  ;;  %521 = vmatmul.f32.gmra.mxu0 %v228_v7  ;;  %v373_v6 = vld [vmem:[#allocation6 + $0x408] sm:$0xff]  ;;  %v390_v7 = vld [vmem:[#allocation6 + $0x490] sm:$0xff] }
  0x75   : > { %590 = vmatmul.f32.gmra.mxu3 %v231_v8  ;;  %687 = vmatpush.msra.mxu0 %v386_v9  ;;  %v405_v8 = vld [vmem:[#allocation6 + $0x508] sm:$0xff]  ;;  %v422_v9 = vld [vmem:[#allocation6 + $0x590] sm:$0xff] }
  0x76   : > { %709 = vmatpush.msra.mxu1 %v403_v10  ;;  %733 = vmatpush.msra.mxu2 %v418_v11  ;;  %v372_v10 = vld [vmem:[#allocation6 + $0x400] sm:$0xff]  ;;  %v389_v11 = vld [vmem:[#allocation6 + $0x488] sm:$0xff] }
  0x77   : > { %755 = vmatpush.msra.mxu3 %v435_v12  ;;  %544 = vmatmul.f32.gmra.mxu1 %v229_v13  ;;  %v404_v12 = vld [vmem:[#allocation6 + $0x500] sm:$0xff]  ;;  %v421_v13 = vld [vmem:[#allocation6 + $0x588] sm:$0xff] }
  0x78   : > { %688 = vmatpush.msra.mxu0 %v385_v14  ;;  %710 = vmatpush.msra.mxu1 %v402_v15  ;;  %v220_v14 = vld [vmem:[%s1316_s18 + $0x40] sm:$0xff]  ;;  %v222_v15 = vld [vmem:[%s1316_s18 + $0x50] sm:$0xff] }
  0x79   : > { %734 = vmatpush.msra.mxu2 %v417_v16  ;;  %756 = vmatpush.msra.mxu3 %v434_v17  ;;  %v451_v16 = vld [vmem:[#allocation6 + $0x678] sm:$0xff] }
  0x7a   : > { %689 = vmatpush.msra.mxu0 %v384_v18  ;;  %711 = vmatpush.msra.mxu1 %v401_v19  ;;  %v483_v17 = vld [vmem:[#allocation6 + $0x778] sm:$0xff]  ;;  %v388_v18 = vld [vmem:[#allocation6 + $0x480] sm:$0xff] }
  0x7b   : > { %735 = vmatpush.msra.mxu2 %v416_v20  ;;  %757 = vmatpush.msra.mxu3 %v433_v21  ;;  %v420_v19 = vld [vmem:[#allocation6 + $0x580] sm:$0xff]  ;;  %v221_v20 = vld [vmem:[%s1316_s18 + $0x48] sm:$0xff]  ;;  %v223_v21 = vld [vmem:[%s1316_s18 + $0x58] sm:$0xff] }
  0x7c   : > { %656 = vmatmul.f32.vlgmr.msrb.gmra.mxu2 %v218_v22  ;;  %690 = vmatpush.msra.mxu0 %v383_v23  ;;  %v450_v22 = vld [vmem:[#allocation6 + $0x670] sm:$0xff]  ;;  %v467_v23 = vld [vmem:[#allocation6 + $0x6f8] sm:$0xff] }
  0x7d   : > { %712 = vmatpush.msra.mxu1 %v400_v24  ;;  %736 = vmatpush.msra.mxu2 %v415_v25  ;;  %v482_v24 = vld [vmem:[#allocation6 + $0x770] sm:$0xff]  ;;  %v499_v25 = vld [vmem:[#allocation6 + $0x7f8] sm:$0xff] }
  0x7e   : > { %758 = vmatpush.msra.mxu3 %v432_v26  ;;  %610 = vmatmul.f32.vlgmr.msrb.gmra.mxu0 %v216_v27  ;;  %v449_v26 = vld [vmem:[#allocation6 + $0x668] sm:$0xff]  ;;  %v466_v27 = vld [vmem:[#allocation6 + $0x6f0] sm:$0xff] }
  0x7f   : > { %679 = vmatmul.f32.vlgmr.msrb.gmra.mxu3 %v219_v28  ;;  %691 = vmatpush.msra.mxu0 %v382_v29  ;;  %v481_v28 = vld [vmem:[#allocation6 + $0x768] sm:$0xff]  ;;  %v498_v29 = vld [vmem:[#allocation6 + $0x7f0] sm:$0xff] }
  0x80   : > { %713 = vmatpush.msra.mxu1 %v399_v30  ;;  %737 = vmatpush.msra.mxu2 %v414_v31  ;;  %v448_v30 = vld [vmem:[#allocation6 + $0x660] sm:$0xff]  ;;  %v465_v31 = vld [vmem:[#allocation6 + $0x6e8] sm:$0xff] }
  0x81   : > { %759 = vmatpush.msra.mxu3 %v431_v32  ;;  %633 = vmatmul.f32.vlgmr.msrb.gmra.mxu1 %v217_v33  ;;  %v480_v32 = vld [vmem:[#allocation6 + $0x760] sm:$0xff]  ;;  %v497_v33 = vld [vmem:[#allocation6 + $0x7e8] sm:$0xff] }
  0x82   : > { %692 = vmatpush.msra.mxu0 %v381_v34  ;;  %714 = vmatpush.msra.mxu1 %v398_v35  ;;  %v238_v34 = vld [vmem:[%s1316_s18 + $0xd0] sm:$0xff]  ;;  %v447_v35 = vld [vmem:[#allocation6 + $0x658] sm:$0xff] }
  0x83   : > { %738 = vmatpush.msra.mxu2 %v413_v36  ;;  %760 = vmatpush.msra.mxu3 %v430_v37  ;;  %v464_v36 = vld [vmem:[#allocation6 + $0x6e0] sm:$0xff]  ;;  %v479_v37 = vld [vmem:[#allocation6 + $0x758] sm:$0xff] }
  0x84   : > { %693 = vmatpush.msra.mxu0 %v380_v38  ;;  %715 = vmatpush.msra.mxu1 %v397_v39  ;;  %v496_v38 = vld [vmem:[#allocation6 + $0x7e0] sm:$0xff] }
  0x85   : > { %739 = vmatpush.msra.mxu2 %v412_v40  ;;  %761 = vmatpush.msra.mxu3 %v429_v41  ;;  %v236_v39 = vld [vmem:[%s1316_s18 + $0xc0] sm:$0xff]  ;;  %v239_v40 = vld [vmem:[%s1316_s18 + $0xd8] sm:$0xff]  ;;  %v446_v41 = vld [vmem:[#allocation6 + $0x650] sm:$0xff] }
  0x86   : > { %694 = vmatpush.msra.mxu0 %v379_v42  ;;  %716 = vmatpush.msra.mxu1 %v396_v43  ;;  %v463_v42 = vld [vmem:[#allocation6 + $0x6d8] sm:$0xff]  ;;  %v478_v43 = vld [vmem:[#allocation6 + $0x750] sm:$0xff] }
  0x87   : > { %740 = vmatpush.msra.mxu2 %v411_v44  ;;  %762 = vmatpush.msra.mxu3 %v428_v45  ;;  %v495_v44 = vld [vmem:[#allocation6 + $0x7d8] sm:$0xff]  ;;  %v237_v45 = vld [vmem:[%s1316_s18 + $0xc8] sm:$0xff] }
  0x88   : > { %695 = vmatpush.msra.mxu0 %v378_v46  ;;  %717 = vmatpush.msra.mxu1 %v395_v47  ;;  %v445_v46 = vld [vmem:[#allocation6 + $0x648] sm:$0xff]  ;;  %v462_v47 = vld [vmem:[#allocation6 + $0x6d0] sm:$0xff] }
  0x89   : > { %741 = vmatpush.msra.mxu2 %v410_v48  ;;  %763 = vmatpush.msra.mxu3 %v427_v49  ;;  %v477_v48 = vld [vmem:[#allocation6 + $0x748] sm:$0xff]  ;;  %v494_v49 = vld [vmem:[#allocation6 + $0x7d0] sm:$0xff] }
  0x8a   : > { %696 = vmatpush.msra.mxu0 %v377_v50  ;;  %718 = vmatpush.msra.mxu1 %v394_v51  ;;  %v444_v50 = vld [vmem:[#allocation6 + $0x640] sm:$0xff]  ;;  %v461_v51 = vld [vmem:[#allocation6 + $0x6c8] sm:$0xff] }
  0x8b   : > { %742 = vmatpush.msra.mxu2 %v409_v52  ;;  %764 = vmatpush.msra.mxu3 %v426_v53  ;;  %v476_v52 = vld [vmem:[#allocation6 + $0x740] sm:$0xff]  ;;  %v493_v53 = vld [vmem:[#allocation6 + $0x7c8] sm:$0xff] }
  0x8c   : > { %697 = vmatpush.msra.mxu0 %v376_v54  ;;  %719 = vmatpush.msra.mxu1 %v393_v55  ;;  %v443_v54 = vld [vmem:[#allocation6 + $0x638] sm:$0xff]  ;;  %v460_v55 = vld [vmem:[#allocation6 + $0x6c0] sm:$0xff] }
  0x8d   : > { %743 = vmatpush.msra.mxu2 %v408_v56  ;;  %765 = vmatpush.msra.mxu3 %v425_v57  ;;  %v475_v56 = vld [vmem:[#allocation6 + $0x738] sm:$0xff]  ;;  %v492_v57 = vld [vmem:[#allocation6 + $0x7c0] sm:$0xff] }
  0x8e   : > { %613 = vmatmul.f32.gmra.mxu0 %v232_v58  ;;  %659 = vmatmul.f32.gmra.mxu2 %v234_v59  ;;  %v442_v58 = vld [vmem:[#allocation6 + $0x630] sm:$0xff]  ;;  %v459_v59 = vld [vmem:[#allocation6 + $0x6b8] sm:$0xff] }
  0x8f   : > { %698 = vmatpush.msra.mxu0 %v375_v60  ;;  %720 = vmatpush.msra.mxu1 %v392_v61  ;;  %v474_v60 = vld [vmem:[#allocation6 + $0x730] sm:$0xff]  ;;  %v491_v61 = vld [vmem:[#allocation6 + $0x7b8] sm:$0xff] }
  0x90   : > { %744 = vmatpush.msra.mxu2 %v407_v62  ;;  %766 = vmatpush.msra.mxu3 %v424_v63  ;;  %v441_v62 = vld [vmem:[#allocation6 + $0x628] sm:$0xff]  ;;  %v458_v63 = vld [vmem:[#allocation6 + $0x6b0] sm:$0xff] }
  0x91   : > { %636 = vmatmul.f32.gmra.mxu1 %v233_v0  ;;  %682 = vmatmul.f32.gmra.mxu3 %v235_v1  ;;  %v473_v0 = vld [vmem:[#allocation6 + $0x728] sm:$0xff]  ;;  %v490_v1 = vld [vmem:[#allocation6 + $0x7b0] sm:$0xff] }
  0x92   : > { %699 = vmatpush.msra.mxu0 %v374_v2  ;;  %721 = vmatpush.msra.mxu1 %v391_v3  ;;  %v440_v2 = vld [vmem:[#allocation6 + $0x620] sm:$0xff]  ;;  %v457_v3 = vld [vmem:[#allocation6 + $0x6a8] sm:$0xff] }
  0x93   : > { %745 = vmatpush.msra.mxu2 %v406_v4  ;;  %767 = vmatpush.msra.mxu3 %v423_v5  ;;  %v472_v4 = vld [vmem:[#allocation6 + $0x720] sm:$0xff]  ;;  %v489_v5 = vld [vmem:[#allocation6 + $0x7a8] sm:$0xff] }
  0x94   : > { %700 = vmatpush.msra.mxu0 %v373_v6  ;;  %722 = vmatpush.msra.mxu1 %v390_v7  ;;  %v439_v6 = vld [vmem:[#allocation6 + $0x618] sm:$0xff]  ;;  %v456_v7 = vld [vmem:[#allocation6 + $0x6a0] sm:$0xff] }
  0x95   : > { %746 = vmatpush.msra.mxu2 %v405_v8  ;;  %768 = vmatpush.msra.mxu3 %v422_v9  ;;  %v471_v8 = vld [vmem:[#allocation6 + $0x718] sm:$0xff]  ;;  %v488_v9 = vld [vmem:[#allocation6 + $0x7a0] sm:$0xff] }
  0x96   : > { %701 = vmatpush.msra.mxu0 %v372_v10  ;;  %723 = vmatpush.msra.mxu1 %v389_v11  ;;  %v438_v10 = vld [vmem:[#allocation6 + $0x610] sm:$0xff]  ;;  %v455_v11 = vld [vmem:[#allocation6 + $0x698] sm:$0xff] }
  0x97   : > { %747 = vmatpush.msra.mxu2 %v404_v12  ;;  %769 = vmatpush.msra.mxu3 %v421_v13  ;;  %v470_v12 = vld [vmem:[#allocation6 + $0x710] sm:$0xff]  ;;  %v487_v13 = vld [vmem:[#allocation6 + $0x798] sm:$0xff] }
  0x98   : > { %702 = vmatmul.f32.vlgmr.msra.gmra.mxu0 %v220_v14  ;;  %748 = vmatmul.f32.vlgmr.msra.gmra.mxu2 %v222_v15  ;;  %v437_v14 = vld [vmem:[#allocation6 + $0x608] sm:$0xff]  ;;  %v454_v15 = vld [vmem:[#allocation6 + $0x690] sm:$0xff] }
  0x99   : > { %778 = vmatpush.msrb.mxu0 %v451_v16  ;;  %824 = vmatpush.msrb.mxu2 %v483_v17  ;;  %v469_v16 = vld [vmem:[#allocation6 + $0x708] sm:$0xff]  ;;  %v486_v17 = vld [vmem:[#allocation6 + $0x790] sm:$0xff] }
  0x9a   : > { %724 = vmatpush.msra.mxu1 %v388_v18  ;;  %770 = vmatpush.msra.mxu3 %v420_v19  ;;  %v436_v18 = vld [vmem:[#allocation6 + $0x600] sm:$0xff]  ;;  %v453_v19 = vld [vmem:[#allocation6 + $0x688] sm:$0xff] }
  0x9b   : > { %725 = vmatmul.f32.vlgmr.msra.gmra.mxu1 %v221_v20  ;;  %771 = vmatmul.f32.vlgmr.msra.gmra.mxu3 %v223_v21  ;;  %v468_v20 = vld [vmem:[#allocation6 + $0x700] sm:$0xff]  ;;  %v485_v21 = vld [vmem:[#allocation6 + $0x788] sm:$0xff] }
  0x9c   : > { %779 = vmatpush.msrb.mxu0 %v450_v22  ;;  %801 = vmatpush.msrb.mxu1 %v467_v23  ;;  %v224_v22 = vld [vmem:[%s1316_s18 + $0x60] sm:$0xff]  ;;  %v226_v23 = vld [vmem:[%s1316_s18 + $0x70] sm:$0xff] }
  0x9d   : > { %825 = vmatpush.msrb.mxu2 %v482_v24  ;;  %847 = vmatpush.msrb.mxu3 %v499_v25  ;;  %v452_v24 = vld [vmem:[#allocation6 + $0x680] sm:$0xff] }
  0x9e   : > { %780 = vmatpush.msrb.mxu0 %v449_v26  ;;  %802 = vmatpush.msrb.mxu1 %v466_v27  ;;  %v484_v25 = vld [vmem:[#allocation6 + $0x780] sm:$0xff]  ;;  %v225_v26 = vld [vmem:[%s1316_s18 + $0x68] sm:$0xff]  ;;  %v227_v27 = vld [vmem:[%s1316_s18 + $0x78] sm:$0xff] }
  0x9f   : > { %826 = vmatpush.msrb.mxu2 %v481_v28  ;;  %848 = vmatpush.msrb.mxu3 %v498_v29  ;;  %v240_v28 = vld [vmem:[%s1316_s18 + $0xe0] sm:$0xff]  ;;  %v242_v29 = vld [vmem:[%s1316_s18 + $0xf0] sm:$0xff] }
  0xa0   : > { %781 = vmatpush.msrb.mxu0 %v448_v30  ;;  %803 = vmatpush.msrb.mxu1 %v465_v31  ;;  %v241_v30 = vld [vmem:[%s1316_s18 + $0xe8] sm:$0xff]  ;;  %v243_v31 = vld [vmem:[%s1316_s18 + $0xf8] sm:$0xff] }
  0xa1   : > { %827 = vmatpush.msrb.mxu2 %v480_v32  ;;  %849 = vmatpush.msrb.mxu3 %v497_v33 }
  0xa2   : > { %751 = vmatmul.f32.gmra.mxu2 %v238_v34  ;;  %782 = vmatpush.msrb.mxu0 %v447_v35 }
  0xa3   : > { %804 = vmatpush.msrb.mxu1 %v464_v36  ;;  %828 = vmatpush.msrb.mxu2 %v479_v37  ;;  %v501_v37 = vstv %s500_s19 }
  0xa4   : > { %850 = vmatpush.msrb.mxu3 %v496_v38  ;;  %705 = vmatmul.f32.gmra.mxu0 %v236_v39 }
  0xa5   : > { %774 = vmatmul.f32.gmra.mxu3 %v239_v40  ;;  %783 = vmatpush.msrb.mxu0 %v446_v41 }
  0xa6   : > { %805 = vmatpush.msrb.mxu1 %v463_v42  ;;  %829 = vmatpush.msrb.mxu2 %v478_v43 }
  0xa7   : > { %851 = vmatpush.msrb.mxu3 %v495_v44  ;;  %728 = vmatmul.f32.gmra.mxu1 %v237_v45 }
  0xa8   : > { %784 = vmatpush.msrb.mxu0 %v445_v46  ;;  %806 = vmatpush.msrb.mxu1 %v462_v47 }
  0xa9   : > { %830 = vmatpush.msrb.mxu2 %v477_v48  ;;  %852 = vmatpush.msrb.mxu3 %v494_v49 }
  0xaa   : > { %785 = vmatpush.msrb.mxu0 %v444_v50  ;;  %807 = vmatpush.msrb.mxu1 %v461_v51 }
  0xab   : > { %831 = vmatpush.msrb.mxu2 %v476_v52  ;;  %853 = vmatpush.msrb.mxu3 %v493_v53 }
  0xac   : > { %786 = vmatpush.msrb.mxu0 %v443_v54  ;;  %808 = vmatpush.msrb.mxu1 %v460_v55 }
  0xad   : > { %832 = vmatpush.msrb.mxu2 %v475_v56  ;;  %854 = vmatpush.msrb.mxu3 %v492_v57 }
  0xae   : > { %787 = vmatpush.msrb.mxu0 %v442_v58  ;;  %809 = vmatpush.msrb.mxu1 %v459_v59 }
  0xaf   : > { %833 = vmatpush.msrb.mxu2 %v474_v60  ;;  %855 = vmatpush.msrb.mxu3 %v491_v61 }
  0xb0   : > { %788 = vmatpush.msrb.mxu0 %v441_v62  ;;  %810 = vmatpush.msrb.mxu1 %v458_v63 }
  0xb1   : > { %834 = vmatpush.msrb.mxu2 %v473_v0  ;;  %856 = vmatpush.msrb.mxu3 %v490_v1 }
  0xb2   : > { %789 = vmatpush.msrb.mxu0 %v440_v2  ;;  %811 = vmatpush.msrb.mxu1 %v457_v3 }
  0xb3   : > { %835 = vmatpush.msrb.mxu2 %v472_v4  ;;  %857 = vmatpush.msrb.mxu3 %v489_v5 }
  0xb4   : > { %790 = vmatpush.msrb.mxu0 %v439_v6  ;;  %812 = vmatpush.msrb.mxu1 %v456_v7 }
  0xb5   : > { %836 = vmatpush.msrb.mxu2 %v471_v8  ;;  %858 = vmatpush.msrb.mxu3 %v488_v9 }
  0xb6   : > { %791 = vmatpush.msrb.mxu0 %v438_v10  ;;  %813 = vmatpush.msrb.mxu1 %v455_v11 }
  0xb7   : > { %837 = vmatpush.msrb.mxu2 %v470_v12  ;;  %859 = vmatpush.msrb.mxu3 %v487_v13 }
  0xb8   : > { %792 = vmatpush.msrb.mxu0 %v437_v14  ;;  %814 = vmatpush.msrb.mxu1 %v454_v15 }
  0xb9   : > { %838 = vmatpush.msrb.mxu2 %v469_v16  ;;  %860 = vmatpush.msrb.mxu3 %v486_v17 }
  0xba   : > { %793 = vmatpush.msrb.mxu0 %v436_v18  ;;  %815 = vmatpush.msrb.mxu1 %v453_v19 }
  0xbb   : > { %839 = vmatpush.msrb.mxu2 %v468_v20  ;;  %861 = vmatpush.msrb.mxu3 %v485_v21 }
  0xbc   : > { %794 = vmatmul.f32.vlgmr.msrb.gmra.mxu0 %v224_v22  ;;  %840 = vmatmul.f32.vlgmr.msrb.gmra.mxu2 %v226_v23 }
  0xbd   : > { %816 = vmatpush.msrb.mxu1 %v452_v24  ;;  %862 = vmatpush.msrb.mxu3 %v484_v25 }
  0xbe   : > { %817 = vmatmul.f32.vlgmr.msrb.gmra.mxu1 %v225_v26  ;;  %863 = vmatmul.f32.vlgmr.msrb.gmra.mxu3 %v227_v27 }
  0xc4   : > { %797 = vmatmul.f32.gmra.mxu0 %v240_v28  ;;  %843 = vmatmul.f32.gmra.mxu2 %v242_v29 }
  0xc6   : > { %820 = vmatmul.f32.gmra.mxu1 %v241_v30  ;;  %866 = vmatmul.f32.gmra.mxu3 %v243_v31 }
  0xe7   : > { %v519_v32 = vpop.f32.mrf.mxu0 }
  0xe8   : > { %v520_v39 = vadd.f32 %v519_v32, %v501_v37 }
  0xea   : > { %v542_v33 = vpop.f32.mrf.mxu1 }
  0xeb   : > { %v565_v34 = vpop.f32.mrf.mxu2  ;;  %v543_v42 = vadd.f32 %v542_v33, %v520_v39 }
  0xed   : > { %v566_v46 = vadd.f32 %v565_v34, %v543_v42 }
  0xee   : > { %v588_v35 = vpop.f32.mrf.mxu3 }
  0xef   : > { %v589_v49 = vadd.f32 %v588_v35, %v566_v46 }
  0xf1   : > { %v522_v36 = vpop.f32.mrf.mxu0 }
  0xf2   : > { %v523_v43 = vadd.f32 %v522_v36, %v501_v37 }
  0xf4   : > { %v545_v38 = vpop.f32.mrf.mxu1 }
  0xf5   : > { %v568_v40 = vpop.f32.mrf.mxu2  ;;  %v546_v47 = vadd.f32 %v545_v38, %v523_v43 }
  0xf7   : > { %v569_v50 = vadd.f32 %v568_v40, %v546_v47 }
  0xf8   : > { %v591_v41 = vpop.f32.mrf.mxu3 }
  0xf9   : > { %v592_v54 = vadd.f32 %v591_v41, %v569_v50 }
  0xfb   : > { %v611_v44 = vpop.f32.mrf.mxu0 }
  0xfc   : > { %v612_v55 = vadd.f32 %v611_v44, %v589_v49 }
  0xfe   : > { %v634_v45 = vpop.f32.mrf.mxu1 }
  0xff   : > { %v657_v48 = vpop.f32.mrf.mxu2  ;;  %v635_v57 = vadd.f32 %v634_v45, %v612_v55 }
 0x101   : > { %v658_v61 = vadd.f32 %v657_v48, %v635_v57 }
 0x102   : > { %v680_v51 = vpop.f32.mrf.mxu3 }
 0x103   : > { %v681_v0 = vadd.f32 %v680_v51, %v658_v61 }
 0x10b   : > { %v614_v52 = vpop.f32.mrf.mxu0 }
 0x10c   : > { %v615_v58 = vadd.f32 %v614_v52, %v592_v54 }
 0x10e   : > { %v637_v53 = vpop.f32.mrf.mxu1 }
 0x10f   : > { %v638_v62 = vadd.f32 %v637_v53, %v615_v58 }
 0x111   : > { %v660_v56 = vpop.f32.mrf.mxu2 }
 0x112   : > { %v661_v1 = vadd.f32 %v660_v56, %v638_v62 }
 0x114   : > { %v683_v59 = vpop.f32.mrf.mxu3 }
 0x115   : > { %v703_v60 = vpop.f32.mrf.mxu0  ;;  %v684_v5 = vadd.f32 %v683_v59, %v661_v1 }
 0x116   : > { %v704_v3 = vadd.f32 %v703_v60, %v681_v0 }
 0x118   : > { %v726_v63 = vpop.f32.mrf.mxu1 }
 0x119   : > { %v727_v7 = vadd.f32 %v726_v63, %v704_v3 }
 0x11b   : > { %v749_v2 = vpop.f32.mrf.mxu2 }
 0x11c   : > { %v750_v9 = vadd.f32 %v749_v2, %v727_v7 }
 0x11e   : > { %v772_v4 = vpop.f32.mrf.mxu3 }
 0x11f   : > { %v773_v12 = vadd.f32 %v772_v4, %v750_v9 }
 0x121   : > { %v706_v6 = vpop.f32.mrf.mxu0 }
 0x122   : > { %v707_v10 = vadd.f32 %v706_v6, %v684_v5 }
 0x124   : > { %v729_v8 = vpop.f32.mrf.mxu1 }
 0x125   : > { %v752_v11 = vpop.f32.mrf.mxu2  ;;  %v730_v13 = vadd.f32 %v729_v8, %v707_v10 }
 0x127   : > { %v753_v18 = vadd.f32 %v752_v11, %v730_v13 }
 0x128   : > { %v775_v14 = vpop.f32.mrf.mxu3 }
 0x129   : > { %v776_v21 = vadd.f32 %v775_v14, %v753_v18 }
 0x139   : > { %v795_v15 = vpop.f32.mrf.mxu0 }
 0x13a   : > { %v796_v16 = vadd.f32 %v795_v15, %v773_v12 }
 0x13b   : > { %v818_v17 = vpop.f32.mrf.mxu1 }
 0x13c   : > { %v819_v19 = vadd.f32 %v818_v17, %v796_v16 }
 0x13f   : > { %v841_v20 = vpop.f32.mrf.mxu2 }
 0x140   : > { %v842_v22 = vadd.f32 %v841_v20, %v819_v19 }
 0x141   : > { %v798_v23 = vpop.f32.mrf.mxu0  ;;  %v864_v24 = vpop.f32.mrf.mxu3 }
 0x142   : > { %v799_v25 = vadd.f32 %v798_v23, %v776_v21  ;;  %v865_v26 = vadd.f32 %v864_v24, %v842_v22 }
 0x143   : > { %v821_v27 = vpop.f32.mrf.mxu1 }
 0x144   : > { %870 = vst [vmem:[%s209_s23] sm:$0xff] %v865_v26  ;;  %v822_v28 = vadd.f32 %v821_v27, %v799_v25 }
 0x147   : > { %v844_v29 = vpop.f32.mrf.mxu2 }
 0x148   : > { %v845_v30 = vadd.f32 %v844_v29, %v822_v28 }
 0x149   : > { %v867_v31 = vpop.f32.mrf.mxu3 }
 0x14a   : > { %v868_v32 = vadd.f32 %v867_v31, %v845_v30 }
 0x14c   : > { %871 = vst [vmem:[%s209_s23 + $0x8] sm:$0xff] %v868_v32 }
 0x14d   : > { %1140 = shalt.err (!%p1137_p10)
}
 0x14e   : > { %s1189_s10 = smov 128   ;;  %s1190_s12 = smov 8  }
 0x14f   : > { %997 = dma.vmem_to_hbm [thread:$0]  (%p1283_p7), %s886_s25, 256, %s888_s26, %s873_s2, %s1189_s10, %s1189_s10, %s1190_s12  }
 0x150 PF: > { %s902_s18 = sand.u32 1, %s1171_s14   ;;  %p1401_p12 = scmp.ge.s32.totalorder %s1183_s17, 2 }
 0x151   : > { %s903_s19 = scalar_lea.sflag [#allocation5], %s902_s18 }
 0x152   : > { %p1008_p13 = pnand %p1401_p12, %p1249_p6 }
 0x154   : > { %p1009_p0 = pneg %p1008_p13 }
 0x156   : > { %1166 = dma.done.wait (%p1009_p0), %s903_s19, 256  }
 0x157   : > { %1168 = vsyncadd (%p1009_p0), %s903_s19, 4294967040  ;;  %p18_p3 = scmp.ge.s32.totalorder %s1267_s27, 4   ;;  %s1402_s14 = smov %s1175_s15 }
 0x158   : > { %s1403_s15 = smov %s1179_s16  ;;  %s1404_s16 = smov %s1279_s5 }
 0x159   : > { %s1405_s17 = smov %s1267_s27  ;;  %20 = sbr.rel (!%p18_p3) target bundleno = 8 (0x8), region = 81 }
 0x15e   :  { %909 = vsyncpa [#allocation4], 1 }
 0x15f   :  { %911 = vsyncpa [#allocation4 + $0x1], 1 }
 0x160   :  { %912 = vsyncpa [#allocation7], 1 }
 0x161   :  { %913 = vsyncpa [#allocation5], 1 }
 0x162   :  { %915 = vsyncpa [#allocation5 + $0x1], 1 }

</bundles_post_ra>
